<compile_context>
chip_gen: v7x
topology: tpu7x:2x2x1
jax: 0.10.0
libtpu: 0.0.40
codegen_flags: <defaults>
</compile_context>

<pallas_src>
import jax
import jax.numpy as jnp
from jax.experimental import pallas as pl
from jax.experimental.pallas import tpu as pltpu

HIDDEN = 50     # matches nn.Linear(inputs, 50)
LANE = 128      # TPU lane width
SUBLANE = 8     # f32 sublane granularity
MAX_TM = 512    # batch tile cap (good mem-bound tile size per measurements)


def _round_up(n, m):
    return ((n + m - 1) // m) * m


def _mlp_kernel(x_ref, w1_ref, b1_ref, w2_ref, b2_ref, o_ref):
    # Hidden layer: x @ W1 + b1, ReLU. Accumulate in f32 on the MXU,
    # keep the epilogue in f32 (free on all generations; avoids bf16 VPU
    # emulation on v5e if inputs ever move to bf16).
    h = jnp.dot(x_ref[...], w1_ref[...], preferred_element_type=jnp.float32)
    h = jnp.maximum(h + b1_ref[...], 0.0)          # (TM, 128) lane-dense
    # Output layer: keep LHS in f32 (no lossy downcast between matmuls).
    o = jnp.dot(h, w2_ref[...], preferred_element_type=jnp.float32)
    o_ref[...] = (o + b2_ref[...]).astype(o_ref.dtype)


def neural_network_forward(x, w1, b1, w2, b2, *, tm=MAX_TM):
    """x: (B, inputs); w1: (inputs, hidden); b1: (hidden,);
       w2: (hidden, outputs); b2: (outputs,)."""
    batch, inputs = x.shape
    hidden = w1.shape[1]
    outputs = w2.shape[1]

    # --- Zero-pad lane dims to multiples of 128 (padded cols/rows are zero,
    #     so they contribute nothing; output is sliced back below). ---
    hid_p = _round_up(hidden, LANE)
    out_p = _round_up(outputs, LANE)
    w1p = jnp.zeros((inputs, hid_p), w1.dtype).at[:, :hidden].set(w1)
    b1p = jnp.zeros((1, hid_p), b1.dtype).at[0, :hidden].set(b1)
    w2p = jnp.zeros((hid_p, out_p), w2.dtype).at[:hidden, :outputs].set(w2)
    b2p = jnp.zeros((1, out_p), b2.dtype).at[0, :outputs].set(b2)

    # --- Batch tile: multiple of 8, capped at MAX_TM; pad batch so the grid
    #     divides evenly (padded rows are sliced away afterwards). ---
    tm = min(tm, _round_up(batch, SUBLANE))
    tm = _round_up(tm, SUBLANE)
    batch_p = _round_up(batch, tm)
    if batch_p != batch:
        xp = jnp.zeros((batch_p, inputs), x.dtype).at[:batch].set(x)
    else:
        xp = x

    grid = (batch_p // tm,)
    out_padded = pl.pallas_call(
        _mlp_kernel,
        out_shape=jax.ShapeDtypeStruct((batch_p, out_p), x.dtype),
        grid=grid,
        in_specs=[
            # x: tiled over batch -> double-buffered by the Pallas pipeline.
            pl.BlockSpec((tm, inputs), lambda i: (i, 0)),
            # Weights / biases: same block every step -> resident in VMEM,
            # DMA'd from HBM only once.
            pl.BlockSpec((inputs, hid_p), lambda i: (0, 0)),
            pl.BlockSpec((1, hid_p), lambda i: (0, 0)),
            pl.BlockSpec((hid_p, out_p), lambda i: (0, 0)),
            pl.BlockSpec((1, out_p), lambda i: (0, 0)),
        ],
        out_specs=pl.BlockSpec((tm, out_p), lambda i: (i, 0)),
        compiler_params=pltpu.CompilerParams(
            dimension_semantics=("parallel",)),  # 2x on v7x dual-TC; no-op on v5e/v6e
    )(xp, w1p, b1p, w2p, b2p)

    # Slice padded rows/columns back off.
    return out_padded[:batch, :outputs]


def reference_forward(x, w1, b1, w2, b2):
    h = jnp.maximum(x @ w1 + b1, 0.0)
    return h @ w2 + b2


if __name__ == "__main__":
    key = jax.random.PRNGKey(0)
    batch, inputs, outputs = 8, 32, 4

    kx, kw1, kb1, kw2, kb2 = jax.random.split(key, 5)
    x = jax.random.normal(kx, (batch, inputs), dtype=jnp.float32)

    # Deterministic init mimicking nn.Linear's uniform(-1/sqrt(fan_in), 1/sqrt(fan_in)).
    lim1 = 1.0 / jnp.sqrt(jnp.float32(inputs))
    w1 = jax.random.uniform(kw1, (inputs, HIDDEN), jnp.float32, -lim1, lim1)
    b1 = jax.random.uniform(kb1, (HIDDEN,), jnp.float32, -lim1, lim1)
    lim2 = 1.0 / jnp.sqrt(jnp.float32(HIDDEN))
    w2 = jax.random.uniform(kw2, (HIDDEN, outputs), jnp.float32, -lim2, lim2)
    b2 = jax.random.uniform(kb2, (outputs,), jnp.float32, -lim2, lim2)

    out = neural_network_forward(x, w1, b1, w2, b2)
    jax.block_until_ready(out)

    ref = reference_forward(x, w1, b1, w2, b2)
    assert out.shape == (batch, outputs)
    assert jnp.allclose(out, ref, atol=1e-5, rtol=1e-5)
    print("KERNEL_OK")
</pallas_src>

<mosaic_0001>
module attributes {stable_mosaic.version = 11 : i64} {
  func.func @_mlp_kernel(%arg0: i32, %arg1: memref<8x32xf32, #tpu.memory_space<vmem>>, %arg2: memref<32x128xf32, #tpu.memory_space<vmem>>, %arg3: memref<1x128xf32, #tpu.memory_space<vmem>>, %arg4: memref<128x128xf32, #tpu.memory_space<vmem>>, %arg5: memref<1x128xf32, #tpu.memory_space<vmem>>, %arg6: memref<8x128xf32, #tpu.memory_space<vmem>>) attributes {dimension_semantics = [#tpu.dimension_semantics<parallel>], iteration_bounds = array<i64: 1>, scalar_prefetch = 0 : i64, scratch_operands = 0 : i64, tpu.core_type = #tpu.core_type<tc>, window_params = [{transform_indices = @transform_0, window_bounds = array<i64: 8, 32>}, {pipeline_mode = #tpu.pipeline_mode<synchronous>, transform_indices = @transform_1, window_bounds = array<i64: 32, 128>}, {pipeline_mode = #tpu.pipeline_mode<synchronous>, transform_indices = @transform_2, window_bounds = array<i64: 1, 128>}, {pipeline_mode = #tpu.pipeline_mode<synchronous>, transform_indices = @transform_3, window_bounds = array<i64: 128, 128>}, {pipeline_mode = #tpu.pipeline_mode<synchronous>, transform_indices = @transform_4, window_bounds = array<i64: 1, 128>}, {transform_indices = @transform_5, window_bounds = array<i64: 8, 128>}]} {
    %c0 = arith.constant 0 : index
    %c0_0 = arith.constant 0 : index
    %0 = vector.load %arg1[%c0, %c0_0] : memref<8x32xf32, #tpu.memory_space<vmem>>, vector<8x32xf32>
    %c0_1 = arith.constant 0 : index
    %c0_2 = arith.constant 0 : index
    %1 = vector.load %arg2[%c0_1, %c0_2] : memref<32x128xf32, #tpu.memory_space<vmem>>, vector<32x128xf32>
    %cst = arith.constant dense<0.000000e+00> : vector<8x128xf32>
    %2 = tpu.matmul %0, %1, %cst {dimension_numbers = #tpu.dot_dimension_numbers<[1], [0], [0], [1], [0, 0, 1, 1], [], []>} : vector<8x32xf32>, vector<32x128xf32>, vector<8x128xf32> -> vector<8x128xf32>
    %c0_3 = arith.constant 0 : index
    %c0_4 = arith.constant 0 : index
    %3 = vector.load %arg3[%c0_3, %c0_4] : memref<1x128xf32, #tpu.memory_space<vmem>>, vector<1x128xf32>
    %4 = vector.broadcast %3 : vector<1x128xf32> to vector<8x128xf32>
    %5 = arith.addf %2, %4 : vector<8x128xf32>
    %cst_5 = arith.constant 0.000000e+00 : f32
    %6 = vector.broadcast %cst_5 : f32 to vector<8x128xf32>
    %7 = arith.maximumf %5, %6 : vector<8x128xf32>
    %c0_6 = arith.constant 0 : index
    %c0_7 = arith.constant 0 : index
    %8 = vector.load %arg4[%c0_6, %c0_7] : memref<128x128xf32, #tpu.memory_space<vmem>>, vector<128x128xf32>
    %cst_8 = arith.constant dense<0.000000e+00> : vector<8x128xf32>
    %9 = tpu.matmul %7, %8, %cst_8 {dimension_numbers = #tpu.dot_dimension_numbers<[1], [0], [0], [1], [0, 0, 1, 1], [], []>} : vector<8x128xf32>, vector<128x128xf32>, vector<8x128xf32> -> vector<8x128xf32>
    %c0_9 = arith.constant 0 : index
    %c0_10 = arith.constant 0 : index
    %10 = vector.load %arg5[%c0_9, %c0_10] : memref<1x128xf32, #tpu.memory_space<vmem>>, vector<1x128xf32>
    %11 = vector.broadcast %10 : vector<1x128xf32> to vector<8x128xf32>
    %12 = arith.addf %9, %11 : vector<8x128xf32>
    %c0_11 = arith.constant 0 : index
    %c0_12 = arith.constant 0 : index
    %13 = vector.load %arg6[%c0_11, %c0_12] : memref<8x128xf32, #tpu.memory_space<vmem>>, vector<8x128xf32>
    tpu.vector_store %arg6[%c0_11, %c0_12], %12 {strides = array<i32>} : memref<8x128xf32, #tpu.memory_space<vmem>>, vector<8x128xf32>,
    return
  }
  func.func @transform_0(%arg0: i32) -> (i32, i32) {
    %c0_i32 = arith.constant 0 : i32
    %c0_i32_0 = arith.constant 0 : i32
    return %arg0, %c0_i32 : i32, i32
  }
  func.func @transform_1(%arg0: i32) -> (i32, i32) {
    %c0_i32 = arith.constant 0 : i32
    %c0_i32_0 = arith.constant 0 : i32
    %c0_i32_1 = arith.constant 0 : i32
    return %c0_i32, %c0_i32_0 : i32, i32
  }
  func.func @transform_2(%arg0: i32) -> (i32, i32) {
    %c0_i32 = arith.constant 0 : i32
    %c0_i32_0 = arith.constant 0 : i32
    %c0_i32_1 = arith.constant 0 : i32
    return %c0_i32, %c0_i32_0 : i32, i32
  }
  func.func @transform_3(%arg0: i32) -> (i32, i32) {
    %c0_i32 = arith.constant 0 : i32
    %c0_i32_0 = arith.constant 0 : i32
    %c0_i32_1 = arith.constant 0 : i32
    return %c0_i32, %c0_i32_0 : i32, i32
  }
  func.func @transform_4(%arg0: i32) -> (i32, i32) {
    %c0_i32 = arith.constant 0 : i32
    %c0_i32_0 = arith.constant 0 : i32
    %c0_i32_1 = arith.constant 0 : i32
    return %c0_i32, %c0_i32_0 : i32, i32
  }
  func.func @transform_5(%arg0: i32) -> (i32, i32) {
    %c0_i32 = arith.constant 0 : i32
    %c0_i32_0 = arith.constant 0 : i32
    return %arg0, %c0_i32 : i32, i32
  }
}

</mosaic_0001>

<bundles_post_ra>
// kernel: tpu_custom_call.1
= control target key start
LH: loop header
LB: loop body
LE: loop exit
PB: predicated region body
PF: predicated region fallthrough
CT: control target
= control target key end

     0   :  { %10 = vsyncpa [#allocation3], 0  ;;  %s560_s0 = inlined_call_operand.hbm [shape: f32[8,32], index: 0, kind: input, shape index: {}]   ;;  %s561_s1 = inlined_call_operand.hbm [shape: f32[32,128], index: 1, kind: input, shape index: {}]   ;;  %s562_s2 = inlined_call_operand.vmem [shape: f32[1,128], index: 2, kind: input, shape index: {}]   ;;  %s563_s3 = inlined_call_operand.hbm [shape: f32[128,128], index: 3, kind: input, shape index: {}]   ;;  %s564_s4 = inlined_call_operand.vmem [shape: f32[1,128], index: 4, kind: input, shape index: {}]   ;;  %s565_s5 = inlined_call_operand.hbm [shape: f32[8,128], index: 5, kind: output, shape index: {}]  }
   0x1   :  { %11 = vsyncpa [#allocation6], 0 }
   0x2   :  { %12 = vsyncpa [#allocation4], 0  ;;  %s461_s18 = smov [#allocation5]   ;;  %s367_s22 = scalar_lea.hbm %s561_s1, 512 }
   0x3   :  { %s28_s19 = sshll.u32 %s461_s18, 4  ;;  %p368_p0 = scmp.ne.s32.totalorder %s561_s1, %s367_s22  ;;  %s29_s19 = int_to_ptr.vmem [resolvable:$true] %s28_s19 }
   0x4   :  { %p371_p1 = scmp.lt.u32.totalorder %s367_s22, %s561_s1 }
   0x6   :  { %p373_p2 = pnand %p371_p1, %p368_p0 }
   0x8   :  { %376 = shalt.err (!%p373_p2)
}
   0x9   :  { %s377_s27 = scalar_lea.vmem %s29_s19, 512  ;;  %p382_p4 = scmp.lt.s32.totalorder %s29_s19, %s29_s19 }
   0xa   :  { %p378_p3 = scmp.ne.s32.totalorder %s29_s19, %s377_s27  ;;  %p383_p5 = scmp.lt.s32.totalorder %s377_s27, %s377_s27 }
   0xc   :  { %p384_p6 = por %p383_p5, %p382_p4 }
   0xe   :  { %p385_p7 = pnand %p384_p6, %p378_p3 }
  0x10   :  { %388 = shalt.err (!%p385_p7)
}
  0x11   :  { %s462_s28 = smov 128   ;;  %s463_s29 = smov 8  }
  0x12   :  { %34 = dma.hbm_to_vmem [thread:$0]  %s561_s1, 512, %s29_s19, [#allocation6], %s462_s28, %s462_s28, %s463_s29  }
  0x13   :  { %s464_s7 = smov [#allocation2]   ;;  %s465_s9 = smov [#allocation7]  }
  0x14   :  { %s19_s8 = sshll.u32 %s464_s7, 4  ;;  %s42_s10 = sshll.u32 %s465_s9, 4  ;;  %s20_s8 = int_to_ptr.vmem [resolvable:$true] %s19_s8  ;;  %s43_s10 = int_to_ptr.vmem [resolvable:$true] %s42_s10 }
  0x15   :  { %s389_s13 = scalar_lea.hbm %s560_s0, 128 }
  0x16   :  { %p390_p8 = scmp.ne.s32.totalorder %s560_s0, %s389_s13  ;;  %p393_p9 = scmp.lt.u32.totalorder %s389_s13, %s560_s0 }
  0x18   :  { %p395_p10 = pnand %p393_p9, %p390_p8 }
  0x1a   :  { %398 = shalt.err (!%p395_p10)
}
  0x1b   :  { %s399_s1 = scalar_lea.vmem %s20_s8, 128  ;;  %p404_p12 = scmp.lt.s32.totalorder %s20_s8, %s20_s8 }
  0x1c   :  { %p400_p11 = scmp.ne.s32.totalorder %s20_s8, %s399_s1  ;;  %p405_p13 = scmp.lt.s32.totalorder %s399_s1, %s399_s1 }
  0x1e   :  { %p406_p0 = por %p405_p13, %p404_p12 }
  0x20   :  { %p407_p1 = pnand %p406_p0, %p400_p11 }
  0x22   :  { %410 = shalt.err (!%p407_p1)
}
  0x23   :  { %22 = dma.hbm_to_vmem [thread:$0]  %s560_s0, 128, %s20_s8, [#allocation3]  }
  0x24   :  { %s411_s22 = scalar_lea.hbm %s563_s3, 2048 }
  0x25   :  { %p412_p2 = scmp.ne.s32.totalorder %s563_s3, %s411_s22  ;;  %p415_p3 = scmp.lt.u32.totalorder %s411_s22, %s563_s3 }
  0x27   :  { %p417_p4 = pnand %p415_p3, %p412_p2 }
  0x29   :  { %420 = shalt.err (!%p417_p4)
}
  0x2a   :  { %s421_s27 = scalar_lea.vmem %s43_s10, 2048  ;;  %p426_p6 = scmp.lt.s32.totalorder %s43_s10, %s43_s10 }
  0x2b   :  { %p422_p5 = scmp.ne.s32.totalorder %s43_s10, %s421_s27  ;;  %p427_p7 = scmp.lt.s32.totalorder %s421_s27, %s421_s27 }
  0x2d   :  { %p428_p8 = por %p427_p7, %p426_p6 }
  0x2f   :  { %p429_p9 = pnand %p428_p8, %p422_p5 }
  0x31   :  { %432 = shalt.err (!%p429_p9)
}
  0x32   :  { %48 = dma.hbm_to_vmem [thread:$0]  %s563_s3, 2048, %s43_s10, [#allocation6], %s462_s28, %s462_s28, %s463_s29  }
  0x33   :  { %455 = dma.done.wait [#allocation3], 128  }
  0x34   :  { %456 = vsyncadd [#allocation3], 4294967168 }
  0x35   :  { %457 = dma.done.wait [#allocation6], 2560  }
  0x36   :  { %458 = vsyncadd [#allocation6], 4294964736  ;;  %v466_v0 = vmov 0.0|0.0   ;;  %vm467_vm0 = vmmov 0   ;;  %v468_v1 = vmov 0.0   ;;  %v61_v2 = vld [vmem:[#allocation5] sm:$0xff] }
  0x37   :  { %328 = vmatprep.subr.bf16.mxu0 %v466_v0  ;;  %290 = vmatprep.mubr.msk.f32.mxu0 %vm467_vm0, %v468_v1  ;;  %v62_v3 = vld [vmem:[#allocation5 + $0x8] sm:$0xff]  ;;  %v63_v4 = vld [vmem:[#allocation5 + $0x10] sm:$0xff]  ;;  %v64_v6 = vld [vmem:[#allocation5 + $0x18] sm:$0xff]  ;;  %vm72_vm1 = vcmask 261120   ;;  %s469_s7 = smov [#allocation8]  }
  0x38   :  { %334 = vmatprep.subr.bf16.mxu1 %v466_v0  ;;  %325 = vmatprep.mubr.msk.f32.mxu1 %vm467_vm0, %v468_v1  ;;  %v329_v5 = vpack.c.bf16 %v62_v3, %v61_v2  ;;  %v147_v7 = vld [vmem:[#allocation7] sm:$0xff]  ;;  %v148_v8 = vld [vmem:[#allocation7 + $0x8] sm:$0xff]  ;;  %v149_v9 = vld [vmem:[#allocation7 + $0x10] sm:$0xff]  ;;  %v332_v11 = vpack.c.bf16 %v64_v6, %v63_v4  ;;  %s247_s8 = sshll.u32 %s469_s7, 4  ;;  %s248_s8 = int_to_ptr.vmem [resolvable:$true] %s247_s8 }
  0x39   :  { %v150_v10 = vld [vmem:[#allocation7 + $0x18] sm:$0xff]  ;;  %v335_v12 = vpack.c.bf16 %v148_v8, %v147_v7  ;;  %v151_v14 = vld [vmem:[#allocation7 + $0x20] sm:$0xff]  ;;  %v152_v15 = vld [vmem:[#allocation7 + $0x28] sm:$0xff]  ;;  %s433_s9 = scalar_lea.vmem %s248_s8, 128  ;;  %p438_p11 = scmp.lt.s32.totalorder %s248_s8, %s248_s8 }
  0x3a   :  { %330 = vmatpush3.bf16.msra.mxu0 %v329_v5  ;;  %v338_v13 = vpack.c.bf16 %v150_v10, %v149_v9  ;;  %v60_v16 = vld [vmem:[#allocation2] sm:$0xff]  ;;  %v341_v17 = vpack.c.bf16 %v152_v15, %v151_v14  ;;  %v153_v18 = vld [vmem:[#allocation7 + $0x30] sm:$0xff]  ;;  %v155_v21 = vld [vmem:[#allocation7 + $0x40] sm:$0xff]  ;;  %p434_p10 = scmp.ne.s32.totalorder %s248_s8, %s433_s9  ;;  %p439_p12 = scmp.lt.s32.totalorder %s433_s9, %s433_s9 }
  0x3b   :  { %331 = vmatprep.subr.bf16.mxu0 %v466_v0  ;;  %336 = vmatpush3.bf16.msra.mxu1 %v335_v12  ;;  %v154_v19 = vld [vmem:[#allocation7 + $0x38] sm:$0xff]  ;;  %v156_v22 = vld [vmem:[#allocation7 + $0x48] sm:$0xff]  ;;  %v157_v24 = vld [vmem:[#allocation7 + $0x50] sm:$0xff] }
  0x3c   :  { %337 = vmatprep.subr.bf16.mxu1 %v466_v0  ;;  %v344_v20 = vpack.c.bf16 %v154_v19, %v153_v18  ;;  %v347_v23 = vpack.c.bf16 %v156_v22, %v155_v21  ;;  %v158_v25 = vld [vmem:[#allocation7 + $0x58] sm:$0xff]  ;;  %v159_v27 = vld [vmem:[#allocation7 + $0x60] sm:$0xff]  ;;  %v160_v28 = vld [vmem:[#allocation7 + $0x68] sm:$0xff]  ;;  %p440_p13 = por %p439_p12, %p438_p11 }
  0x3d   :  { %v350_v26 = vpack.c.bf16 %v158_v25, %v157_v24  ;;  %v353_v29 = vpack.c.bf16 %v160_v28, %v159_v27  ;;  %v161_v30 = vld [vmem:[#allocation7 + $0x70] sm:$0xff]  ;;  %v162_v31 = vld [vmem:[#allocation7 + $0x78] sm:$0xff] }
  0x3e   :  { %333 = vmatpush3.bf16.msra.mxu0 %v332_v11  ;;  %v356_v32 = vpack.c.bf16 %v162_v31, %v161_v30  ;;  %v257_v33 = vld [vmem:[%s562_s2] ss:$0 sm:$0xff]  ;;  %p441_p0 = pnand %p440_p13, %p434_p10 }
  0x3f   :  { %339 = vmatpush3.bf16.msra.mxu1 %v338_v13  ;;  %v259_v38 = vld [vmem:[%s564_s4] ss:$0 sm:$0xff] }
  0x40   :  { %340 = vmatprep.subr.bf16.mxu1 %v466_v0 }
  0x41   :  { %291 = vmatmul.mubr.msk.f32.vlgmr.msra.gmra.mrb[0].mxu0 %vm72_vm1, %v60_v16 }
  0x43   :  { %342 = vmatpush3.bf16.msra.mxu1 %v341_v17 }
  0x44   :  { %343 = vmatprep.subr.bf16.mxu1 %v466_v0 }
  0x47   :  { %345 = vmatpush3.bf16.msra.mxu1 %v344_v20 }
  0x48   :  { %346 = vmatprep.subr.bf16.mxu1 %v466_v0 }
  0x4b   :  { %348 = vmatpush3.bf16.msra.mxu1 %v347_v23 }
  0x4c   :  { %349 = vmatprep.subr.bf16.mxu1 %v466_v0 }
  0x4f   :  { %351 = vmatpush3.bf16.msra.mxu1 %v350_v26 }
  0x50   :  { %352 = vmatprep.subr.bf16.mxu1 %v466_v0 }
  0x53   :  { %354 = vmatpush3.bf16.msra.mxu1 %v353_v29 }
  0x54   :  { %355 = vmatprep.subr.bf16.mxu1 %v466_v0 }
  0x57   :  { %357 = vmatpush3.bf16.msra.mxu1 %v356_v32 }
 0x114   :  { %v142_v34 = vpop.f32.mrb[0].mxu0 }
 0x115   :  { %v143_v35 = vadd.f32 %v257_v33, %v142_v34  ;;  %v292_v36 = vpop.f32.mrb[1].mxu0 }
 0x117   :  { %v146_v37 = vmax.f32 %v143_v35, 0.0 }
 0x119   :  { %326 = vmatmul.mubr.f32.vlgmr.msra.gmra.mrb[0].mxu1 %v146_v37 }
 0x1ec   :  { %v236_v39 = vpop.f32.mrb[0].mxu1 }
 0x1ed   :  { %v237_v40 = vadd.f32 %v259_v38, %v236_v39  ;;  %v327_v41 = vpop.f32.mrb[1].mxu1 }
 0x1ef   :  { %240 = vst [vmem:[#allocation8] sm:$0xff] %v237_v40 }
 0x1f0   :  { %444 = shalt.err (!%p441_p0)
}
 0x1f1   :  { %s445_s11 = scalar_lea.hbm %s565_s5, 128 }
 0x1f2   :  { %p446_p1 = scmp.ne.s32.totalorder %s565_s5, %s445_s11  ;;  %p449_p2 = scmp.lt.u32.totalorder %s445_s11, %s565_s5 }
 0x1f4   :  { %p451_p3 = pnand %p449_p2, %p446_p1 }
 0x1f6   :  { %454 = shalt.err (!%p451_p3)
}
 0x1f7   :  { %250 = dma.vmem_to_hbm [thread:$0]  %s248_s8, 128, %s565_s5, [#allocation4]  }
 0x1f8   :  { %459 = dma.done.wait [#allocation4], 128  }
 0x1f9   :  { %460 = vsyncadd [#allocation4], 4294967168 }
 0x1fa   :  { %254 = vsyncpa [#allocation3], 1 }
 0x1fb   :  { %255 = vsyncpa [#allocation6], 1 }
 0x1fc   :  { %256 = vsyncpa [#allocation4], 1 }

</bundles_post_ra>
